<compile_context>
chip_gen: v5e
topology: v5e:2x2
jax: 0.10.0
libtpu: 0.0.40
codegen_flags: <defaults>
</compile_context>

<pallas_src>
import math
import functools

import jax
import jax.numpy as jnp
import numpy as np
from jax import lax
from jax.experimental import pallas as pl
from jax.experimental.pallas import tpu as pltpu


def _mha_kernel(q_ref, k_ref, v_ref, mask_ref,
                wq_ref, wk_ref, wv_ref, wo_ref,
                o_ref, *, num_heads: int, dk: int):
    # Per-batch tiles: (1, S, D) -> take the single batch row. Keep input dtype.
    q = q_ref[0]                       # (S, D)
    k = k_ref[0]                       # (S, D)
    v = v_ref[0]                       # (S, D)
    mask = mask_ref[0, 0]              # (S, S) int32

    wq = wq_ref[...]                   # (D, D)  (out, in)
    wk = wk_ref[...]
    wv = wv_ref[...]
    wo = wo_ref[...]

    compute_dtype = q.dtype
    S, D = q.shape

    # x @ W.T without materializing W.T: contract W's 'in' axis (dim 1).
    cdims = (((1,), (1,)), ((), ()))
    scale = jnp.float32(1.0 / math.sqrt(dk))

    # Projections: native-dtype MXU matmuls with f32 accumulation.
    Qp = lax.dot_general(q, wq, cdims, preferred_element_type=jnp.float32)  # (S, D)
    Kp = lax.dot_general(k, wk, cdims, preferred_element_type=jnp.float32)  # (S, D)
    Vp = lax.dot_general(v, wv, cdims, preferred_element_type=jnp.float32)  # (S, D)

    # Fold 1/sqrt(dk) into Q once, then drop back to the compute dtype.
    Q = (Qp * scale).astype(compute_dtype)
    K = Kp.astype(compute_dtype)
    V = Vp.astype(compute_dtype)

    # Additive mask bias computed ONCE per batch row, shared by all heads (f32).
    bias = jnp.where(mask == 0, jnp.float32(-1e9), jnp.float32(0.0))        # (S, S)

    out_acc = jnp.zeros((S, D), jnp.float32)

    # Small static head count: Python loop unrolls into the kernel body.
    for h in range(num_heads):
        lo = h * dk
        Qh = Q[:, lo:lo + dk]          # (S, dk)
        Kh = K[:, lo:lo + dk]          # (S, dk)
        Vh = V[:, lo:lo + dk]          # (S, dk)

        # Qh @ Kh.T without transposing Kh: contract the dk axes of both.
        scores = lax.dot_general(Qh, Kh, cdims,
                                 preferred_element_type=jnp.float32)        # (S, S)
        scores = scores + bias

        # Numerically-stable softmax, all in f32.
        m = jnp.max(scores, axis=-1, keepdims=True)
        e = jnp.exp(scores - m)
        denom = jnp.sum(e, axis=-1, keepdims=True)
        probs = (e * pl.reciprocal(denom, approx=True)).astype(compute_dtype)

        ctx = jnp.dot(probs, Vh, preferred_element_type=jnp.float32)        # (S, dk)

        # Head h's contribution to the output projection:
        #   ctx_h @ W_o[:, lo:lo+dk].T  accumulated in f32 (replaces concat + final GEMM).
        wo_h = wo[:, lo:lo + dk]                                            # (D, dk)
        out_acc = out_acc + lax.dot_general(
            ctx.astype(compute_dtype), wo_h, cdims,
            preferred_element_type=jnp.float32)                             # (S, D)

    o_ref[0] = out_acc.astype(o_ref.dtype)


def multi_head_attention(q, k, v, mask, wq, wk, wv, wo, *, num_heads: int):
    B, S, D = q.shape
    assert D % num_heads == 0
    dk = D // num_heads

    mask = mask.astype(jnp.int32)

    kernel = functools.partial(_mha_kernel, num_heads=num_heads, dk=dk)

    qkv_spec = pl.BlockSpec((1, S, D), lambda b: (b, 0, 0))
    mask_spec = pl.BlockSpec((1, 1, S, S), lambda b: (b, 0, 0, 0))
    w_spec = pl.BlockSpec((D, D), lambda b: (0, 0))

    return pl.pallas_call(
        kernel,
        out_shape=jax.ShapeDtypeStruct((B, S, D), q.dtype),
        grid_spec=pltpu.PrefetchScalarGridSpec(
            num_scalar_prefetch=0,
            grid=(B,),
            in_specs=[qkv_spec, qkv_spec, qkv_spec, mask_spec,
                      w_spec, w_spec, w_spec, w_spec],
            out_specs=qkv_spec,
        ),
        compiler_params=pltpu.CompilerParams(
            dimension_semantics=("parallel",),
            vmem_limit_bytes=32 * 1024 * 1024,
        ),
    )(q, k, v, mask, wq, wk, wv, wo)


def _reference(q, k, v, mask, wq, wk, wv, wo, num_heads):
    B, S, D = q.shape
    dk = D // num_heads
    Q = q @ wq.T
    K = k @ wk.T
    V = v @ wv.T
    Q = Q.reshape(B, S, num_heads, dk).transpose(0, 2, 1, 3)
    K = K.reshape(B, S, num_heads, dk).transpose(0, 2, 1, 3)
    V = V.reshape(B, S, num_heads, dk).transpose(0, 2, 1, 3)
    scores = Q @ jnp.swapaxes(K, -2, -1) / math.sqrt(dk)
    scores = jnp.where(mask == 0, -1e9, scores)
    probs = jax.nn.softmax(scores, axis=-1)
    attn = probs @ V
    x = attn.transpose(0, 2, 1, 3).reshape(B, S, D)
    return x @ wo.T


if __name__ == "__main__":
    B, S, D, H = 2, 8, 32, 4
    key = jax.random.PRNGKey(0)
    kq, kk, kv_, kwq, kwk, kwv, kwo = jax.random.split(key, 7)

    q = jax.random.normal(kq, (B, S, D), dtype=jnp.float32)
    k = jax.random.normal(kk, (B, S, D), dtype=jnp.float32)
    v = jax.random.normal(kv_, (B, S, D), dtype=jnp.float32)

    # Causal mask, shape (B, 1, S, S); 0 entries are masked to -1e9.
    causal = jnp.tril(jnp.ones((S, S), dtype=jnp.int32))
    mask = jnp.broadcast_to(causal[None, None], (B, 1, S, S))

    # Deterministic nn.Linear-style init: U(-1/sqrt(D), 1/sqrt(D)), shape (out, in).
    bound = 1.0 / math.sqrt(D)
    wq = jax.random.uniform(kwq, (D, D), jnp.float32, -bound, bound)
    wk = jax.random.uniform(kwk, (D, D), jnp.float32, -bound, bound)
    wv = jax.random.uniform(kwv, (D, D), jnp.float32, -bound, bound)
    wo = jax.random.uniform(kwo, (D, D), jnp.float32, -bound, bound)

    ref = _reference(q, k, v, mask, wq, wk, wv, wo, H)

    # f32 path (tolerance slightly relaxed vs 1e-4 because of the approximate
    # EUP reciprocal in the softmax denominator).
    out = multi_head_attention(q, k, v, mask, wq, wk, wv, wo, num_heads=H)
    out = jax.block_until_ready(out)
    np.testing.assert_allclose(np.asarray(out), np.asarray(ref), rtol=2e-3, atol=2e-3)

    # bf16 path: matmuls run natively in bf16 on the MXU, softmax stays f32.
    bf = jnp.bfloat16
    out_bf16 = multi_head_attention(
        q.astype(bf), k.astype(bf), v.astype(bf), mask,
        wq.astype(bf), wk.astype(bf), wv.astype(bf), wo.astype(bf), num_heads=H)
    out_bf16 = jax.block_until_ready(out_bf16)
    np.testing.assert_allclose(np.asarray(out_bf16, dtype=np.float32),
                               np.asarray(ref), rtol=5e-2, atol=5e-2)

    print("KERNEL_OK")
</pallas_src>

<mosaic_0001>
module attributes {stable_mosaic.version = 11 : i64} {
  func.func @_mha_kernel(%arg0: i32, %arg1: memref<1x8x32xf32, #tpu.memory_space<vmem>>, %arg2: memref<1x8x32xf32, #tpu.memory_space<vmem>>, %arg3: memref<1x8x32xf32, #tpu.memory_space<vmem>>, %arg4: memref<1x1x8x8xi32, #tpu.memory_space<vmem>>, %arg5: memref<32x32xf32, #tpu.memory_space<vmem>>, %arg6: memref<32x32xf32, #tpu.memory_space<vmem>>, %arg7: memref<32x32xf32, #tpu.memory_space<vmem>>, %arg8: memref<32x32xf32, #tpu.memory_space<vmem>>, %arg9: memref<1x8x32xf32, #tpu.memory_space<vmem>>) attributes {dimension_semantics = [#tpu.dimension_semantics<parallel>], iteration_bounds = array<i64: 2>, scalar_prefetch = 0 : i64, scratch_operands = 0 : i64, tpu.core_type = #tpu.core_type<tc>, window_params = [{transform_indices = @transform_0, window_bounds = array<i64: 1, 8, 32>}, {transform_indices = @transform_1, window_bounds = array<i64: 1, 8, 32>}, {transform_indices = @transform_2, window_bounds = array<i64: 1, 8, 32>}, {transform_indices = @transform_3, window_bounds = array<i64: 1, 1, 8, 8>}, {pipeline_mode = #tpu.pipeline_mode<synchronous>, transform_indices = @transform_4, window_bounds = array<i64: 32, 32>}, {pipeline_mode = #tpu.pipeline_mode<synchronous>, transform_indices = @transform_5, window_bounds = array<i64: 32, 32>}, {pipeline_mode = #tpu.pipeline_mode<synchronous>, transform_indices = @transform_6, window_bounds = array<i64: 32, 32>}, {pipeline_mode = #tpu.pipeline_mode<synchronous>, transform_indices = @transform_7, window_bounds = array<i64: 32, 32>}, {transform_indices = @transform_8, window_bounds = array<i64: 1, 8, 32>}]} {
    %c0 = arith.constant 0 : index
    %c0_0 = arith.constant 0 : index
    %c0_1 = arith.constant 0 : index
    %0 = vector.load %arg1[%c0, %c0_0, %c0_1] : memref<1x8x32xf32, #tpu.memory_space<vmem>>, vector<1x8x32xf32>
    %1 = vector.shape_cast %0 : vector<1x8x32xf32> to vector<8x32xf32>
    %c0_2 = arith.constant 0 : index
    %c0_3 = arith.constant 0 : index
    %c0_4 = arith.constant 0 : index
    %2 = vector.load %arg2[%c0_2, %c0_3, %c0_4] : memref<1x8x32xf32, #tpu.memory_space<vmem>>, vector<1x8x32xf32>
    %3 = vector.shape_cast %2 : vector<1x8x32xf32> to vector<8x32xf32>
    %c0_5 = arith.constant 0 : index
    %c0_6 = arith.constant 0 : index
    %c0_7 = arith.constant 0 : index
    %4 = vector.load %arg3[%c0_5, %c0_6, %c0_7] : memref<1x8x32xf32, #tpu.memory_space<vmem>>, vector<1x8x32xf32>
    %5 = vector.shape_cast %4 : vector<1x8x32xf32> to vector<8x32xf32>
    %c0_8 = arith.constant 0 : index
    %c0_9 = arith.constant 0 : index
    %c0_10 = arith.constant 0 : index
    %c0_11 = arith.constant 0 : index
    %6 = vector.load %arg4[%c0_8, %c0_9, %c0_10, %c0_11] : memref<1x1x8x8xi32, #tpu.memory_space<vmem>>, vector<1x1x8x8xi32>
    %7 = vector.shape_cast %6 : vector<1x1x8x8xi32> to vector<8x8xi32>
    %c0_12 = arith.constant 0 : index
    %c0_13 = arith.constant 0 : index
    %8 = vector.load %arg5[%c0_12, %c0_13] : memref<32x32xf32, #tpu.memory_space<vmem>>, vector<32x32xf32>
    %c0_14 = arith.constant 0 : index
    %c0_15 = arith.constant 0 : index
    %9 = vector.load %arg6[%c0_14, %c0_15] : memref<32x32xf32, #tpu.memory_space<vmem>>, vector<32x32xf32>
    %c0_16 = arith.constant 0 : index
    %c0_17 = arith.constant 0 : index
    %10 = vector.load %arg7[%c0_16, %c0_17] : memref<32x32xf32, #tpu.memory_space<vmem>>, vector<32x32xf32>
    %c0_18 = arith.constant 0 : index
    %c0_19 = arith.constant 0 : index
    %11 = vector.load %arg8[%c0_18, %c0_19] : memref<32x32xf32, #tpu.memory_space<vmem>>, vector<32x32xf32>
    %cst = arith.constant dense<0.000000e+00> : vector<8x32xf32>
    %12 = tpu.matmul %1, %8, %cst {dimension_numbers = #tpu.dot_dimension_numbers<[1], [1], [0], [0], [0, 0, 1, 0], [], []>} : vector<8x32xf32>, vector<32x32xf32>, vector<8x32xf32> -> vector<8x32xf32>
    %cst_20 = arith.constant dense<0.000000e+00> : vector<8x32xf32>
    %13 = tpu.matmul %3, %9, %cst_20 {dimension_numbers = #tpu.dot_dimension_numbers<[1], [1], [0], [0], [0, 0, 1, 0], [], []>} : vector<8x32xf32>, vector<32x32xf32>, vector<8x32xf32> -> vector<8x32xf32>
    %cst_21 = arith.constant dense<0.000000e+00> : vector<8x32xf32>
    %14 = tpu.matmul %5, %10, %cst_21 {dimension_numbers = #tpu.dot_dimension_numbers<[1], [1], [0], [0], [0, 0, 1, 0], [], []>} : vector<8x32xf32>, vector<32x32xf32>, vector<8x32xf32> -> vector<8x32xf32>
    %cst_22 = arith.constant 0.353553385 : f32
    %15 = vector.broadcast %cst_22 : f32 to vector<8x32xf32>
    %16 = arith.mulf %12, %15 : vector<8x32xf32>
    %c0_i32 = arith.constant 0 : i32
    %17 = vector.broadcast %c0_i32 : i32 to vector<8x8xi32>
    %18 = arith.cmpi eq, %7, %17 : vector<8x8xi32>
    %cst_23 = arith.constant -1.000000e+09 : f32
    %cst_24 = arith.constant 0.000000e+00 : f32
    %19 = vector.broadcast %cst_23 : f32 to vector<8x8xf32>
    %20 = vector.broadcast %cst_24 : f32 to vector<8x8xf32>
    %21 = arith.select %18, %19, %20 : vector<8x8xi1>, vector<8x8xf32>
    %cst_25 = arith.constant 0.000000e+00 : f32
    %22 = vector.broadcast %cst_25 : f32 to vector<8x32xf32>
    %23 = vector.extract_strided_slice %16 {offsets = [0, 0], sizes = [8, 8], strides = [1, 1]} : vector<8x32xf32> to vector<8x8xf32>
    %24 = vector.extract_strided_slice %13 {offsets = [0, 0], sizes = [8, 8], strides = [1, 1]} : vector<8x32xf32> to vector<8x8xf32>
    %25 = vector.extract_strided_slice %14 {offsets = [0, 0], sizes = [8, 8], strides = [1, 1]} : vector<8x32xf32> to vector<8x8xf32>
    %cst_26 = arith.constant dense<0.000000e+00> : vector<8x8xf32>
    %26 = tpu.matmul %23, %24, %cst_26 {dimension_numbers = #tpu.dot_dimension_numbers<[1], [1], [0], [0], [0, 0, 1, 0], [], []>} : vector<8x8xf32>, vector<8x8xf32>, vector<8x8xf32> -> vector<8x8xf32>
    %27 = arith.addf %26, %21 : vector<8x8xf32>
    %cst_27 = arith.constant dense<0xFF800000> : vector<8xf32>
    %28 = vector.multi_reduction <maximumf>, %27, %cst_27 [1] : vector<8x8xf32> to vector<8xf32>
    %29 = vector.shape_cast %28 : vector<8xf32> to vector<8x1xf32>
    %30 = vector.broadcast %29 : vector<8x1xf32> to vector<8x8xf32>
    %31 = arith.subf %27, %30 : vector<8x8xf32>
    %32 = math.exp %31 : vector<8x8xf32>
    %cst_28 = arith.constant dense<0.000000e+00> : vector<8xf32>
    %33 = vector.multi_reduction <add>, %32, %cst_28 [1] : vector<8x8xf32> to vector<8xf32>
    %34 = vector.shape_cast %33 : vector<8xf32> to vector<8x1xf32>
    %35 = tpu.reciprocal %34 {approx = true} : vector<8x1xf32> -> vector<8x1xf32>
    %36 = vector.broadcast %35 : vector<8x1xf32> to vector<8x8xf32>
    %37 = arith.mulf %32, %36 : vector<8x8xf32>
    %cst_29 = arith.constant dense<0.000000e+00> : vector<8x8xf32>
    %38 = tpu.matmul %37, %25, %cst_29 {dimension_numbers = #tpu.dot_dimension_numbers<[1], [0], [0], [1], [0, 0, 1, 1], [], []>} : vector<8x8xf32>, vector<8x8xf32>, vector<8x8xf32> -> vector<8x8xf32>
    %39 = vector.extract_strided_slice %11 {offsets = [0, 0], sizes = [32, 8], strides = [1, 1]} : vector<32x32xf32> to vector<32x8xf32>
    %cst_30 = arith.constant dense<0.000000e+00> : vector<8x32xf32>
    %40 = tpu.matmul %38, %39, %cst_30 {dimension_numbers = #tpu.dot_dimension_numbers<[1], [1], [0], [0], [0, 0, 1, 0], [], []>} : vector<8x8xf32>, vector<32x8xf32>, vector<8x32xf32> -> vector<8x32xf32>
    %41 = arith.addf %22, %40 : vector<8x32xf32>
    %42 = vector.extract_strided_slice %16 {offsets = [0, 8], sizes = [8, 8], strides = [1, 1]} : vector<8x32xf32> to vector<8x8xf32>
    %43 = vector.extract_strided_slice %13 {offsets = [0, 8], sizes = [8, 8], strides = [1, 1]} : vector<8x32xf32> to vector<8x8xf32>
    %44 = vector.extract_strided_slice %14 {offsets = [0, 8], sizes = [8, 8], strides = [1, 1]} : vector<8x32xf32> to vector<8x8xf32>
    %cst_31 = arith.constant dense<0.000000e+00> : vector<8x8xf32>
    %45 = tpu.matmul %42, %43, %cst_31 {dimension_numbers = #tpu.dot_dimension_numbers<[1], [1], [0], [0], [0, 0, 1, 0], [], []>} : vector<8x8xf32>, vector<8x8xf32>, vector<8x8xf32> -> vector<8x8xf32>
    %46 = arith.addf %45, %21 : vector<8x8xf32>
    %cst_32 = arith.constant dense<0xFF800000> : vector<8xf32>
    %47 = vector.multi_reduction <maximumf>, %46, %cst_32 [1] : vector<8x8xf32> to vector<8xf32>
    %48 = vector.shape_cast %47 : vector<8xf32> to vector<8x1xf32>
    %49 = vector.broadcast %48 : vector<8x1xf32> to vector<8x8xf32>
    %50 = arith.subf %46, %49 : vector<8x8xf32>
    %51 = math.exp %50 : vector<8x8xf32>
    %cst_33 = arith.constant dense<0.000000e+00> : vector<8xf32>
    %52 = vector.multi_reduction <add>, %51, %cst_33 [1] : vector<8x8xf32> to vector<8xf32>
    %53 = vector.shape_cast %52 : vector<8xf32> to vector<8x1xf32>
    %54 = tpu.reciprocal %53 {approx = true} : vector<8x1xf32> -> vector<8x1xf32>
    %55 = vector.broadcast %54 : vector<8x1xf32> to vector<8x8xf32>
    %56 = arith.mulf %51, %55 : vector<8x8xf32>
    %cst_34 = arith.constant dense<0.000000e+00> : vector<8x8xf32>
    %57 = tpu.matmul %56, %44, %cst_34 {dimension_numbers = #tpu.dot_dimension_numbers<[1], [0], [0], [1], [0, 0, 1, 1], [], []>} : vector<8x8xf32>, vector<8x8xf32>, vector<8x8xf32> -> vector<8x8xf32>
    %58 = vector.extract_strided_slice %11 {offsets = [0, 8], sizes = [32, 8], strides = [1, 1]} : vector<32x32xf32> to vector<32x8xf32>
    %cst_35 = arith.constant dense<0.000000e+00> : vector<8x32xf32>
    %59 = tpu.matmul %57, %58, %cst_35 {dimension_numbers = #tpu.dot_dimension_numbers<[1], [1], [0], [0], [0, 0, 1, 0], [], []>} : vector<8x8xf32>, vector<32x8xf32>, vector<8x32xf32> -> vector<8x32xf32>
    %60 = arith.addf %41, %59 : vector<8x32xf32>
    %61 = vector.extract_strided_slice %16 {offsets = [0, 16], sizes = [8, 8], strides = [1, 1]} : vector<8x32xf32> to vector<8x8xf32>
    %62 = vector.extract_strided_slice %13 {offsets = [0, 16], sizes = [8, 8], strides = [1, 1]} : vector<8x32xf32> to vector<8x8xf32>
    %63 = vector.extract_strided_slice %14 {offsets = [0, 16], sizes = [8, 8], strides = [1, 1]} : vector<8x32xf32> to vector<8x8xf32>
    %cst_36 = arith.constant dense<0.000000e+00> : vector<8x8xf32>
    %64 = tpu.matmul %61, %62, %cst_36 {dimension_numbers = #tpu.dot_dimension_numbers<[1], [1], [0], [0], [0, 0, 1, 0], [], []>} : vector<8x8xf32>, vector<8x8xf32>, vector<8x8xf32> -> vector<8x8xf32>
    %65 = arith.addf %64, %21 : vector<8x8xf32>
    %cst_37 = arith.constant dense<0xFF800000> : vector<8xf32>
    %66 = vector.multi_reduction <maximumf>, %65, %cst_37 [1] : vector<8x8xf32> to vector<8xf32>
    %67 = vector.shape_cast %66 : vector<8xf32> to vector<8x1xf32>
    %68 = vector.broadcast %67 : vector<8x1xf32> to vector<8x8xf32>
    %69 = arith.subf %65, %68 : vector<8x8xf32>
    %70 = math.exp %69 : vector<8x8xf32>
    %cst_38 = arith.constant dense<0.000000e+00> : vector<8xf32>
    %71 = vector.multi_reduction <add>, %70, %cst_38 [1] : vector<8x8xf32> to vector<8xf32>
    %72 = vector.shape_cast %71 : vector<8xf32> to vector<8x1xf32>
    %73 = tpu.reciprocal %72 {approx = true} : vector<8x1xf32> -> vector<8x1xf32>
    %74 = vector.broadcast %73 : vector<8x1xf32> to vector<8x8xf32>
    %75 = arith.mulf %70, %74 : vector<8x8xf32>
    %cst_39 = arith.constant dense<0.000000e+00> : vector<8x8xf32>
    %76 = tpu.matmul %75, %63, %cst_39 {dimension_numbers = #tpu.dot_dimension_numbers<[1], [0], [0], [1], [0, 0, 1, 1], [], []>} : vector<8x8xf32>, vector<8x8xf32>, vector<8x8xf32> -> vector<8x8xf32>
    %77 = vector.extract_strided_slice %11 {offsets = [0, 16], sizes = [32, 8], strides = [1, 1]} : vector<32x32xf32> to vector<32x8xf32>
    %cst_40 = arith.constant dense<0.000000e+00> : vector<8x32xf32>
    %78 = tpu.matmul %76, %77, %cst_40 {dimension_numbers = #tpu.dot_dimension_numbers<[1], [1], [0], [0], [0, 0, 1, 0], [], []>} : vector<8x8xf32>, vector<32x8xf32>, vector<8x32xf32> -> vector<8x32xf32>
    %79 = arith.addf %60, %78 : vector<8x32xf32>
    %80 = vector.extract_strided_slice %16 {offsets = [0, 24], sizes = [8, 8], strides = [1, 1]} : vector<8x32xf32> to vector<8x8xf32>
    %81 = vector.extract_strided_slice %13 {offsets = [0, 24], sizes = [8, 8], strides = [1, 1]} : vector<8x32xf32> to vector<8x8xf32>
    %82 = vector.extract_strided_slice %14 {offsets = [0, 24], sizes = [8, 8], strides = [1, 1]} : vector<8x32xf32> to vector<8x8xf32>
    %cst_41 = arith.constant dense<0.000000e+00> : vector<8x8xf32>
    %83 = tpu.matmul %80, %81, %cst_41 {dimension_numbers = #tpu.dot_dimension_numbers<[1], [1], [0], [0], [0, 0, 1, 0], [], []>} : vector<8x8xf32>, vector<8x8xf32>, vector<8x8xf32> -> vector<8x8xf32>
    %84 = arith.addf %83, %21 : vector<8x8xf32>
    %cst_42 = arith.constant dense<0xFF800000> : vector<8xf32>
    %85 = vector.multi_reduction <maximumf>, %84, %cst_42 [1] : vector<8x8xf32> to vector<8xf32>
    %86 = vector.shape_cast %85 : vector<8xf32> to vector<8x1xf32>
    %87 = vector.broadcast %86 : vector<8x1xf32> to vector<8x8xf32>
    %88 = arith.subf %84, %87 : vector<8x8xf32>
    %89 = math.exp %88 : vector<8x8xf32>
    %cst_43 = arith.constant dense<0.000000e+00> : vector<8xf32>
    %90 = vector.multi_reduction <add>, %89, %cst_43 [1] : vector<8x8xf32> to vector<8xf32>
    %91 = vector.shape_cast %90 : vector<8xf32> to vector<8x1xf32>
    %92 = tpu.reciprocal %91 {approx = true} : vector<8x1xf32> -> vector<8x1xf32>
    %93 = vector.broadcast %92 : vector<8x1xf32> to vector<8x8xf32>
    %94 = arith.mulf %89, %93 : vector<8x8xf32>
    %cst_44 = arith.constant dense<0.000000e+00> : vector<8x8xf32>
    %95 = tpu.matmul %94, %82, %cst_44 {dimension_numbers = #tpu.dot_dimension_numbers<[1], [0], [0], [1], [0, 0, 1, 1], [], []>} : vector<8x8xf32>, vector<8x8xf32>, vector<8x8xf32> -> vector<8x8xf32>
    %96 = vector.extract_strided_slice %11 {offsets = [0, 24], sizes = [32, 8], strides = [1, 1]} : vector<32x32xf32> to vector<32x8xf32>
    %cst_45 = arith.constant dense<0.000000e+00> : vector<8x32xf32>
    %97 = tpu.matmul %95, %96, %cst_45 {dimension_numbers = #tpu.dot_dimension_numbers<[1], [1], [0], [0], [0, 0, 1, 0], [], []>} : vector<8x8xf32>, vector<32x8xf32>, vector<8x32xf32> -> vector<8x32xf32>
    %98 = arith.addf %79, %97 : vector<8x32xf32>
    %c0_46 = arith.constant 0 : index
    %c0_47 = arith.constant 0 : index
    %c0_48 = arith.constant 0 : index
    %99 = vector.load %arg9[%c0_46, %c0_47, %c0_48] : memref<1x8x32xf32, #tpu.memory_space<vmem>>, vector<1x8x32xf32>
    %100 = vector.shape_cast %99 : vector<1x8x32xf32> to vector<8x32xf32>
    %101 = vector.shape_cast %98 : vector<8x32xf32> to vector<1x8x32xf32>
    tpu.vector_store %arg9[%c0_46, %c0_47, %c0_48], %101 {strides = array<i32>} : memref<1x8x32xf32, #tpu.memory_space<vmem>>, vector<1x8x32xf32>,
    return
  }
  func.func @transform_0(%arg0: i32) -> (i32, i32, i32) {
    %c0_i32 = arith.constant 0 : i32
    %c0_i32_0 = arith.constant 0 : i32
    %c0_i32_1 = arith.constant 0 : i32
    return %arg0, %c0_i32, %c0_i32_0 : i32, i32, i32
  }
  func.func @transform_1(%arg0: i32) -> (i32, i32, i32) {
    %c0_i32 = arith.constant 0 : i32
    %c0_i32_0 = arith.constant 0 : i32
    %c0_i32_1 = arith.constant 0 : i32
    return %arg0, %c0_i32, %c0_i32_0 : i32, i32, i32
  }
  func.func @transform_2(%arg0: i32) -> (i32, i32, i32) {
    %c0_i32 = arith.constant 0 : i32
    %c0_i32_0 = arith.constant 0 : i32
    %c0_i32_1 = arith.constant 0 : i32
    return %arg0, %c0_i32, %c0_i32_0 : i32, i32, i32
  }
  func.func @transform_3(%arg0: i32) -> (i32, i32, i32, i32) {
    %c0_i32 = arith.constant 0 : i32
    %c0_i32_0 = arith.constant 0 : i32
    %c0_i32_1 = arith.constant 0 : i32
    %c0_i32_2 = arith.constant 0 : i32
    return %arg0, %c0_i32, %c0_i32_0, %c0_i32_1 : i32, i32, i32, i32
  }
  func.func @transform_4(%arg0: i32) -> (i32, i32) {
    %c0_i32 = arith.constant 0 : i32
    %c0_i32_0 = arith.constant 0 : i32
    %c0_i32_1 = arith.constant 0 : i32
    return %c0_i32, %c0_i32_0 : i32, i32
  }
  func.func @transform_5(%arg0: i32) -> (i32, i32) {
    %c0_i32 = arith.constant 0 : i32
    %c0_i32_0 = arith.constant 0 : i32
    %c0_i32_1 = arith.constant 0 : i32
    return %c0_i32, %c0_i32_0 : i32, i32
  }
  func.func @transform_6(%arg0: i32) -> (i32, i32) {
    %c0_i32 = arith.constant 0 : i32
    %c0_i32_0 = arith.constant 0 : i32
    %c0_i32_1 = arith.constant 0 : i32
    return %c0_i32, %c0_i32_0 : i32, i32
  }
  func.func @transform_7(%arg0: i32) -> (i32, i32) {
    %c0_i32 = arith.constant 0 : i32
    %c0_i32_0 = arith.constant 0 : i32
    %c0_i32_1 = arith.constant 0 : i32
    return %c0_i32, %c0_i32_0 : i32, i32
  }
  func.func @transform_8(%arg0: i32) -> (i32, i32, i32) {
    %c0_i32 = arith.constant 0 : i32
    %c0_i32_0 = arith.constant 0 : i32
    %c0_i32_1 = arith.constant 0 : i32
    return %arg0, %c0_i32, %c0_i32_0 : i32, i32, i32
  }
}

</mosaic_0001>

<bundles_post_ra>
// kernel: tpu_custom_call.1
= control target key start
LH: loop header
LB: loop body
LE: loop exit
PB: predicated region body
PF: predicated region fallthrough
CT: control target
= control target key end

     0   :  { %s2209_s0 = inlined_call_operand.hbm [shape: f32[2,8,32], index: 0, kind: input, shape index: {}]   ;;  %s2210_s1 = inlined_call_operand.hbm [shape: f32[2,8,32], index: 1, kind: input, shape index: {}]   ;;  %s2211_s2 = inlined_call_operand.hbm [shape: f32[2,8,32], index: 2, kind: input, shape index: {}]   ;;  %s2212_s3 = inlined_call_operand.hbm [shape: s32[2,1,8,8], index: 3, kind: input, shape index: {}]   ;;  %s2213_s4 = inlined_call_operand.hbm [shape: f32[32,32], index: 4, kind: input, shape index: {}]   ;;  %s2214_s5 = inlined_call_operand.hbm [shape: f32[32,32], index: 5, kind: input, shape index: {}]   ;;  %s2215_s6 = inlined_call_operand.hbm [shape: f32[32,32], index: 6, kind: input, shape index: {}]   ;;  %s2216_s7 = inlined_call_operand.hbm [shape: f32[32,32], index: 7, kind: input, shape index: {}]   ;;  %s2217_s8 = inlined_call_operand.hbm [shape: f32[2,8,32], index: 8, kind: output, shape index: {}]  }
   0x1   :  { %2228 = sst [smem:[#allocation27_spill]] %s2210_s1 }
   0x2   :  { %2229 = sst [smem:[#allocation28_spill]] %s2213_s4 }
   0x3   :  { %2230 = sst [smem:[#allocation29_spill]] %s2214_s5 }
   0x4   :  { %2231 = sst [smem:[#allocation30_spill]] %s2215_s6 }
   0x5   :  { %2232 = sst [smem:[#allocation31_spill]] %s2216_s7 }
   0x6   :  { %13 = vsyncpa [#allocation3], 0 }
   0x7   :  { %15 = vsyncpa [#allocation3 + $0x1], 0 }
   0x8   :  { %16 = vsyncpa [#allocation6], 0 }
   0x9   :  { %18 = vsyncpa [#allocation6 + $0x1], 0 }
   0xa   :  { %19 = vsyncpa [#allocation9], 0 }
   0xb   :  { %21 = vsyncpa [#allocation9 + $0x1], 0 }
   0xc   :  { %22 = vsyncpa [#allocation12], 0 }
   0xd   :  { %23 = vsyncpa [#allocation15], 0 }
   0xe   :  { %24 = vsyncpa [#allocation4], 0 }
   0xf   :  { %26 = vsyncpa [#allocation4 + $0x1], 0  ;;  %s1817_s27 = smov 0   ;;  %s1819_s28 = smov 0  }
  0x10   :  { %s1821_s29 = smov 0   ;;  %s1823_s30 = smov 0  }
  0x11 LB: > { %s1838_s9 = sadd.s32 4294967295, %s1760_s30   ;;  %s1234_s10 = sadd.s32 4294967294, %s1760_s30   ;;  %s1760_s30 = sphi %s1823_s30, %s2259_s30   ;;  %s1756_s29 = sphi %s1821_s29, %s2263_s29   ;;  %s1752_s28 = sphi %s1819_s28, %s2262_s28   ;;  %s1748_s27 = sphi %s1817_s27, %s2261_s27  }
  0x12   : > { %p52_p0 = scmp.ne.s32.totalorder %s1752_s28, %s1748_s27  ;;  %p2225_p1 = scmp.eq.s32.totalorder %s1838_s9, 0 }
  0x13   : > { %p238_p2 = scmp.eq.s32.totalorder %s1838_s9, 1  ;;  %p244_p3 = scmp.eq.s32.totalorder %s1234_s10, 1 }
  0x14   : > { %p1847_p4 = por %p2225_p1, %p52_p0  ;;  %p1235_p5 = scmp.ge.s32.totalorder %s1760_s30, 1 }
  0x15   : > { %p1852_p6 = por %p244_p3, %p52_p0  ;;  %p251_p7 = scmp.lt.s32.totalorder %s1760_s30, 3 }
  0x16   : > { %s2236_s4 = sld [smem:[#allocation28_spill]]  ;;  %s1762_s17 = smov [#allocation10]  }
  0x17   : > { %s2234_s12 = scalar_select %p1852_p6, 1, 0 }
  0x18   : > { %p1860_p8 = pnand %p1235_p5, %p251_p7  ;;  %s264_s18 = sshll.u32 %s1762_s17, 4  ;;  %s265_s18 = int_to_ptr.vmem [resolvable:$true] %s264_s18 }
  0x19   : > { %2235 = sst [smem:[#allocation24_spill]] %s2234_s12  ;;  %s2218_s23 = smov 128  }
  0x1a   : > { %p1336_p9 = pneg %p1860_p8  ;;  %s2239_s5 = sld [smem:[#allocation29_spill]] }
  0x1b   : > { %s2220_s24 = smov 8   ;;  %s1765_s25 = smov [#allocation11]  }
  0x1c   : > { %s262_s15 = sshll.u32 %s2236_s4, 4  ;;  %p1868_p10 = pnand %p1336_p9, %p2225_p1  ;;  %s263_s15 = int_to_ptr.hbm [resolvable:$true] %s262_s15 }
  0x1d   : > { %s278_s26 = sshll.u32 %s1765_s25, 4  ;;  %s1887_s10 = sadd.s32 1, %s1760_s30   ;;  %s279_s26 = int_to_ptr.vmem [resolvable:$true] %s278_s26 }
  0x1e   : > { %1339 = dma.hbm_to_vmem [thread:$0]  (!%p1868_p10), %s263_s15, 512, %s265_s18, [#allocation9], %s2218_s23, %s2218_s23, %s2220_s24  }
  0x1f   : > { %2240 = sst [smem:[#allocation25_spill]] %s1887_s10  ;;  %s39_s13 = sadd.s32 1, %s1756_s29 }
  0x20   : > { %s276_s22 = sshll.u32 %s2239_s5, 4  ;;  %s36_s14 = ssub.s32 %s1760_s30, %s1887_s10  ;;  %s277_s22 = int_to_ptr.hbm [resolvable:$true] %s276_s22 }
  0x21   : > { %1342 = dma.hbm_to_vmem [thread:$0]  (!%p1868_p10), %s277_s22, 512, %s279_s26, [#allocation12], %s2218_s23, %s2218_s23, %s2220_s24  }
  0x22   : > { %p46_p12 = scmp.ne.s32.totalorder %s1756_s29, %s1752_s28  ;;  %p37_p13 = scmp.eq.s32.totalorder %s36_s14, 0 }
  0x23   : > { %p47_p0 = scmp.eq.s32.totalorder %s1760_s30, 0  ;;  %p1370_p5 = scmp.lt.s32.totalorder %s1760_s30, 2 }
  0x24   : > { %p1897_p3 = por %p238_p2, %p46_p12  ;;  %s2222_s18 = sand.u32 1, %s1756_s29  }
  0x25   : > { %s1903_s17 = scalar_select %p37_p13, %s1756_s29, %s39_s13  }
  0x26   : > { %p48_p7 = por %p47_p0, %p46_p12  ;;  %s1908_s20 = sshll.u32 %s2222_s18, 3 }
  0x27   : > { %2242 = sst [smem:[#allocation26_spill]] %s1903_s17  ;;  %s1911_s21 = sshll.u32 %s1760_s30, 3 }
  0x28   : > { %p1913_p9 = pnand %p1370_p5, %p48_p7  ;;  %s2226_s25 = sand.u32 1, %s1760_s30  }
  0x29   : > { %s2244_s1 = sld [smem:[#allocation27_spill]]  ;;  %s343_s24 = scalar_lea.vmem [#allocation5], %s1908_s20 }
  0x2a   : > { %s351_s4 = sshll.u32 %s343_s24, 4  ;;  %s1925_s18 = scalar_lea.sflag [#allocation6], %s2226_s25  ;;  %s352_s4 = int_to_ptr.vmem [resolvable:$true] %s351_s4 }
  0x2b   : > { %p1498_p12 = pneg %p1913_p9 }
  0x2f   : > { %s347_s13 = scalar_lea.hbm %s2244_s1, %s1911_s21 }
  0x30   : > { %s349_s23 = sshll.u32 %s347_s13, 4  ;;  %s1501_s13 = scalar_lea.hbm %s2244_s1, 16  ;;  %s350_s23 = int_to_ptr.hbm [resolvable:$true] %s349_s23 }
  0x31   : > { %s1494_s5 = sshra.s32 %s350_s23, 4  ;;  %s1495_s5 = int_to_ptr.hbm [resolvable:$true] %s1494_s5 }
  0x32   : > { %s1496_s17 = scalar_lea.hbm %s1495_s5, 8  ;;  %p1502_p5 = scmp.lt.s32.totalorder %s1495_s5, %s2244_s1 }
  0x33   : > { %p1497_p2 = scmp.ne.s32.totalorder %s1495_s5, %s1496_s17  ;;  %p1503_p7 = scmp.lt.s32.totalorder %s1501_s13, %s1496_s17 }
  0x35   : > { %p1499_p13 = pnand %p1498_p12, %p1497_p2  ;;  %p1504_p11 = por %p1503_p7, %p1502_p5 }
  0x37   : > { %p1500_p0 = pneg %p1499_p13 }
  0x39   : > { %p1505_p1 = pnand %p1504_p11, %p1500_p0 }
  0x3b   : > { %1508 = shalt.err (!%p1505_p1)
}
  0x3c   : > { %1355 = dma.hbm_to_vmem [thread:$0]  (!%p1913_p9), %s350_s23, 128, %s352_s4, %s1925_s18  }
  0x3d   : > { %s2245_s6 = sld [smem:[#allocation30_spill]]  ;;  %s1766_s14 = smov [#allocation13]  }
  0x3e   : > { %s292_s5 = sshll.u32 %s1766_s14, 4  ;;  %s2246_s7 = sld [smem:[#allocation31_spill]]  ;;  %s293_s5 = int_to_ptr.vmem [resolvable:$true] %s292_s5 }
  0x3f   : > { %s2247_s24 = smov 8   ;;  %s2248_s1 = smov 128  }
  0x40   : > { %s1767_s4 = smov [#allocation14]   ;;  %s324_s10 = scalar_lea.vmem [#allocation2], %s1908_s20 }
  0x41   : > { %s306_s23 = sshll.u32 %s1767_s4, 4  ;;  %s332_s17 = sshll.u32 %s324_s10, 4  ;;  %s307_s23 = int_to_ptr.vmem [resolvable:$true] %s306_s23  ;;  %s333_s17 = int_to_ptr.vmem [resolvable:$true] %s332_s17 }
  0x42   : > { %s1591_s25 = scalar_lea.hbm %s2209_s0, 16 }
  0x43   : > { %s290_s26 = sshll.u32 %s2245_s6, 4  ;;  %s328_s6 = scalar_lea.hbm %s2209_s0, %s1911_s21  ;;  %s291_s26 = int_to_ptr.hbm [resolvable:$true] %s290_s26 }
  0x44   : > { %s304_s13 = sshll.u32 %s2246_s7, 4  ;;  %s330_s14 = sshll.u32 %s328_s6, 4  ;;  %s305_s13 = int_to_ptr.hbm [resolvable:$true] %s304_s13  ;;  %s331_s14 = int_to_ptr.hbm [resolvable:$true] %s330_s14 }
  0x45   : > { %1345 = dma.hbm_to_vmem [thread:$0]  (!%p1868_p10), %s291_s26, 512, %s293_s5, [#allocation12], %s2248_s1, %s2248_s1, %s2247_s24  }
  0x46   : > { %1348 = dma.hbm_to_vmem [thread:$0]  (!%p1868_p10), %s305_s13, 512, %s307_s23, [#allocation15], %s2248_s1, %s2248_s1, %s2247_s24  }
  0x47   : > { %s2249_s7 = sand.u32 1, %s1756_s29   ;;  %s1584_s5 = sshra.s32 %s331_s14, 4  ;;  %s1585_s5 = int_to_ptr.hbm [resolvable:$true] %s1584_s5 }
  0x48   : > { %s321_s26 = scalar_lea.sflag [#allocation3], %s2249_s7  ;;  %s1586_s4 = scalar_lea.hbm %s1585_s5, 8 }
  0x49   : > { %p1587_p1 = scmp.ne.s32.totalorder %s1585_s5, %s1586_s4  ;;  %p1592_p10 = scmp.lt.s32.totalorder %s1585_s5, %s2209_s0 }
  0x4a   : > { %p1593_p13 = scmp.lt.s32.totalorder %s1591_s25, %s1586_s4 }
  0x4b   : > { %p1589_p11 = pnand %p1587_p1, %p1498_p12 }
  0x4c   : > { %p1594_p0 = por %p1593_p13, %p1592_p10 }
  0x4d   : > { %p1590_p2 = pneg %p1589_p11 }
  0x4f   : > { %p1595_p5 = pnand %p1594_p0, %p1590_p2 }
  0x51   : > { %1598 = shalt.err (!%p1595_p5)
}
  0x52   : > { %1352 = dma.hbm_to_vmem [thread:$0]  (!%p1913_p9), %s331_s14, 128, %s333_s17, %s321_s26  }
  0x53   : > { %s366_s24 = scalar_lea.hbm %s2211_s2, %s1911_s21  ;;  %s362_s10 = scalar_lea.vmem [#allocation7], %s1908_s20 }
  0x54   : > { %s368_s23 = sshll.u32 %s366_s24, 4  ;;  %s370_s19 = sshll.u32 %s362_s10, 4  ;;  %s369_s23 = int_to_ptr.hbm [resolvable:$true] %s368_s23  ;;  %s371_s19 = int_to_ptr.vmem [resolvable:$true] %s370_s19 }
  0x55   : > { %s1614_s5 = sshra.s32 %s369_s23, 4  ;;  %s1621_s14 = scalar_lea.hbm %s2211_s2, 16  ;;  %s1615_s5 = int_to_ptr.hbm [resolvable:$true] %s1614_s5 }
  0x56   : > { %s1616_s4 = scalar_lea.hbm %s1615_s5, 8  ;;  %p1622_p2 = scmp.lt.s32.totalorder %s1615_s5, %s2211_s2 }
  0x57   : > { %p1617_p7 = scmp.ne.s32.totalorder %s1615_s5, %s1616_s4  ;;  %p1623_p10 = scmp.lt.s32.totalorder %s1621_s14, %s1616_s4 }
  0x59   : > { %p1619_p1 = pnand %p1617_p7, %p1498_p12  ;;  %p1624_p13 = por %p1623_p10, %p1622_p2 }
  0x5b   : > { %p1620_p11 = pneg %p1619_p1 }
  0x5d   : > { %p1625_p0 = pnand %p1624_p13, %p1620_p11 }
  0x5f   : > { %1628 = shalt.err (!%p1625_p0)
}
  0x60   : > { %1358 = dma.hbm_to_vmem [thread:$0]  (!%p1913_p9), %s369_s23, 128, %s371_s19, %s1925_s18  }
  0x61   : > { %s385_s7 = scalar_lea.hbm %s2212_s3, %s1911_s21  ;;  %s381_s24 = scalar_lea.vmem [#allocation8], %s1908_s20 }
  0x62   : > { %s387_s13 = sshll.u32 %s385_s7, 4  ;;  %s389_s10 = sshll.u32 %s381_s24, 4  ;;  %s388_s13 = int_to_ptr.hbm [resolvable:$true] %s387_s13  ;;  %s390_s10 = int_to_ptr.vmem [resolvable:$true] %s389_s10 }
  0x63   : > { %s2250_s5 = sand.u32 1, %s1760_s30   ;;  %s1644_s12 = sshra.s32 %s388_s13, 4  ;;  %s1645_s12 = int_to_ptr.hbm [resolvable:$true] %s1644_s12 }
  0x64   : > { %s378_s4 = scalar_lea.sflag [#allocation9], %s2250_s5  ;;  %s1646_s25 = scalar_lea.hbm %s1645_s12, 8 }
  0x65   : > { %p1647_p5 = scmp.ne.s32.totalorder %s1645_s12, %s1646_s25  ;;  %s1651_s19 = scalar_lea.hbm %s2212_s3, 16 }
  0x66   : > { %p1652_p11 = scmp.lt.s32.totalorder %s1645_s12, %s2212_s3  ;;  %p1653_p2 = scmp.lt.s32.totalorder %s1651_s19, %s1646_s25 }
  0x67   : > { %p1649_p7 = pnand %p1647_p5, %p1498_p12 }
  0x68   : > { %p1654_p10 = por %p1653_p2, %p1652_p11 }
  0x69   : > { %p1650_p1 = pneg %p1649_p7 }
  0x6b   : > { %p1655_p13 = pnand %p1654_p10, %p1650_p1 }
  0x6d   : > { %1658 = shalt.err (!%p1655_p13)
}
  0x6e   : > { %1361 = dma.hbm_to_vmem [thread:$0]  (!%p1913_p9), %s388_s13, 128, %s390_s10, %s378_s4  }
  0x6f   : > { %398 = sbr.rel (%p1860_p8) target bundleno = 1735 (0x6c7), region = 52  ;;  %s2013_s20 = sand.u32 (!%p1860_p8), 1, %s1752_s28  }
  0x70   : > { %s2016_s17 = sshll.u32 (!%p1860_p8), %s2013_s20, 3  ;;  %s401_s26 = scalar_lea.sflag (!%p1860_p8), [#allocation3], %s2013_s20 }
  0x71   : > { %s404_s1 = scalar_lea.vmem (!%p1860_p8), [#allocation2], %s2016_s17 }
  0x74   : > { %1719 = dma.done.wait (%p1847_p4), %s401_s26, 128  }
  0x75   : > { %1721 = vsyncadd (%p1847_p4), %s401_s26, 4294967168  ;;  %s410_s16 = sand.u32 1, %s1838_s9   ;;  %s414_s6 = scalar_lea.vmem [#allocation5], %s2016_s17 }
  0x76   : > { %s411_s22 = scalar_lea.sflag [#allocation6], %s410_s16 }
  0x77   : > { %1723 = dma.done.wait (%p1847_p4), %s411_s22, 256  }
  0x78   : > { %1725 = vsyncadd (%p1847_p4), %s411_s22, 4294967040  ;;  %s424_s7 = scalar_lea.vmem [#allocation7], %s2016_s17  ;;  %s431_s13 = scalar_lea.sflag [#allocation9], %s410_s16 }
  0x79   : > { %s434_s24 = scalar_lea.vmem [#allocation8], %s2016_s17 }
  0x7a   : > { %1727 = dma.done.wait (%p1847_p4), %s431_s13, 128  }
  0x7b   : > { %1729 = vsyncadd (%p1847_p4), %s431_s13, 4294967168  ;;  %p2251_p8 = scmp.eq.s32.totalorder %s1838_s9, 0 }
  0x7d   : > { %1731 = dma.done.wait (%p2251_p8), [#allocation9], 512   ;;  %p2252_p9 = pmov %p2251_p8 }
  0x7e   : > { %p2253_p12 = pmov %p2251_p8 }
  0x7f   : > { %1733 = vsyncadd (%p2252_p9), [#allocation9], 4294966784 }
  0x80   : > { %1735 = dma.done.wait (%p2253_p12), [#allocation12], 1024   ;;  %p2254_p0 = pmov %p2251_p8 }
  0x82   : > { %1737 = vsyncadd (%p2254_p0), [#allocation12], 4294966272  ;;  %p2255_p5 = pmov %p2254_p0 }
  0x83   : > { %p2256_p7 = pmov %p2254_p0 }
  0x84   : > { %1739 = dma.done.wait (%p2255_p5), [#allocation15], 512  }
  0x85   : > { %1741 = vsyncadd (%p2256_p7), [#allocation15], 4294966784  ;;  %vm523_vm0 = vcmask 261120   ;;  %v514_v0 = vld [vmem:[#allocation11 + $0x18] sm:$0xff]  ;;  %v513_v2 = vld [vmem:[#allocation11 + $0x10] sm:$0xff]  ;;  %vm632_vm1 = vcmask 64512  }
  0x86   : > { %v510_v1 = vld [vmem:[#allocation10 + $0x18] sm:$0xff]  ;;  %1264 = vmatpush.xpose.msk.msra.mxu1 %vm523_vm0, %v514_v0  ;;  %v509_v3 = vld [vmem:[#allocation10 + $0x10] sm:$0xff]  ;;  %v512_v6 = vld [vmem:[#allocation11 + $0x8] sm:$0xff]  ;;  %s1768_s11 = smov 112   ;;  %s1769_s10 = smov 120   ;;  %v1770_v21 = vmov 0.0  }
  0x87   : > { %1259 = vmatpush.xpose.msk.msra.mxu0 %vm523_vm0, %v510_v1  ;;  %v518_v4 = vld [vmem:[#allocation13 + $0x18] sm:$0xff]  ;;  %v517_v5 = vld [vmem:[#allocation13 + $0x10] sm:$0xff]  ;;  %v508_v7 = vld [vmem:[#allocation10 + $0x8] sm:$0xff]  ;;  %s1771_s5 = smov 104   ;;  %s1307_s4 = sshll.u32 %s1838_s9, 3 }
  0x88   : > { %1269 = vmatpush.xpose.msk.msra.mxu2 %vm523_vm0, %v518_v4  ;;  %v516_v8 = vld [vmem:[#allocation13 + $0x8] sm:$0xff]  ;;  %v511_v9 = vld [vmem:[#allocation11] sm:$0xff]  ;;  %v504_v11 = vld [vmem:[%s414_s6] sm:$0xff]  ;;  %s1055_s18 = scalar_lea.hbm %s2217_s8, %s1307_s4  ;;  %s502_s23 = scalar_lea.vmem [#allocation16], %s2016_s17 }
  0x89   : > { %v507_v10 = vld [vmem:[#allocation10] sm:$0xff]  ;;  %v506_v20 = vld [vmem:[%s434_s24] sm:$0xff]  ;;  %v2099_v34 = vld [vmem:[#allocation14 + $0x8] sm:$0xff]  ;;  %s1057_s19 = sshll.u32 %s502_s23, 4  ;;  %s1059_s21 = sshll.u32 %s1055_s18, 4  ;;  %s1058_s19 = int_to_ptr.vmem [resolvable:$true] %s1057_s19  ;;  %s1060_s21 = int_to_ptr.hbm [resolvable:$true] %s1059_s21 }
  0x8a   : > { %1265 = vmatpush.xpose.msk.msra.mxu1 %vm523_vm0, %v513_v2  ;;  %v503_v12 = vld [vmem:[%s404_s1] sm:$0xff]  ;;  %vm630_vm2 = vcmp.eq.s32.totalorder %v506_v20, 0  ;;  %v2091_v31 = vld [vmem:[#allocation14 + $0x18] sm:$0xff]  ;;  %v2095_v32 = vld [vmem:[#allocation14 + $0x10] sm:$0xff]  ;;  %s1045_s14 = scalar_lea.sflag [#allocation4], %s2013_s20  ;;  %s1688_s26 = sshra.s32 %s1060_s21, 4  ;;  %s1689_s26 = int_to_ptr.hbm [resolvable:$true] %s1688_s26 }
  0x8b   : > { %1260 = vmatpush.xpose.msk.msra.mxu0 %vm523_vm0, %v509_v3  ;;  %v515_v13 = vld [vmem:[#allocation13] sm:$0xff]  ;;  %v2086_v22 = vsel %vm630_vm2, -1e+09, %v1770_v21  ;;  %s1690_s9 = scalar_lea.hbm %s1689_s26, 8  ;;  %s1694_s17 = scalar_lea.hbm %s2217_s8, 16 }
  0x8c   : > { %1270 = vmatpush.xpose.msk.msra.mxu2 %vm523_vm0, %v517_v5  ;;  %v505_v14 = vld [vmem:[%s424_s7] sm:$0xff]  ;;  %p1691_p4 = scmp.ne.s32.totalorder %s1689_s26, %s1690_s9  ;;  %p1695_p2 = scmp.lt.s32.totalorder %s1689_s26, %s2217_s8 }
  0x8d   : > { %v2103_v35 = vld [vmem:[#allocation14] sm:$0xff]  ;;  %p1696_p10 = scmp.lt.s32.totalorder %s1694_s17, %s1690_s9 }
  0x8e   : > { %1266 = vmatpush.xpose.msk.msra.mxu1 %vm523_vm0, %v512_v6  ;;  %p1692_p1 = pnand %p1691_p4, %p1897_p3 }
  0x8f   : > { %1261 = vmatpush.xpose.msk.msra.mxu0 %vm523_vm0, %v508_v7  ;;  %p1697_p13 = por %p1696_p10, %p1695_p2 }
  0x90   : > { %1271 = vmatpush.xpose.msk.msra.mxu2 %vm523_vm0, %v516_v8  ;;  %p1693_p11 = pneg %p1692_p1 }
  0x92   : > { %1267 = vmatpush.xpose.msk.msra.mxu1 %vm523_vm0, %v511_v9  ;;  %p1698_p8 = pnand %p1697_p13, %p1693_p11 }
  0x93   : > { %1262 = vmatpush.xpose.msk.msra.mxu0 %vm523_vm0, %v507_v10 }
  0x94   : > { %1272 = vmatpush.xpose.msk.msra.mxu2 %vm523_vm0, %v515_v13 }
  0x95   : > { %1268 = vmatmul.msk.f32.vlgmr.msra.gmra.mxu1 %vm523_vm0, %v504_v11 }
  0x96   : > { %1263 = vmatmul.msk.f32.vlgmr.msra.gmra.mxu0 %vm523_vm0, %v503_v12 }
  0x97   : > { %1273 = vmatmul.msk.f32.vlgmr.msra.gmra.mxu2 %vm523_vm0, %v505_v14 }
  0x98   : > { %1285 = vmatpush.xpose.msk.msrb.mxu2 %vm632_vm1, %v2091_v31 }
  0x9c   : > { %1286 = vmatpush.xpose.msk.msrb.mxu2 %vm632_vm1, %v2095_v32 }
  0xa0   : > { %1287 = vmatpush.xpose.msk.msrb.mxu2 %vm632_vm1, %v2099_v34 }
  0xa4   : > { %1288 = vmatpush.xpose.msk.msrb.mxu2 %vm632_vm1, %v2103_v35 }
 0x112   : > { %v2069_v15 = vpop.f32.mrf.mxu1 }
 0x113   : > { %v556_v16 = vpop.f32.mrf.mxu0  ;;  %835 = vrot.lane.b32.xlu2 %v2069_v15, %s1768_s11  ;;  %695 = vrot.lane.b32.xlu1 %v2069_v15, %s1769_s10 }
 0x114   : > { %v629_v17 = vmul.f32 0.35355338, %v556_v16  ;;  %1274 = vmatpush.xpose.msk.msra.mxu3 %vm632_vm1, %v2069_v15 }
 0x117   : > { %1275 = vmatmul.msk.f32.vlgmr.msra.gmra.mxu3 %vm632_vm1, %v629_v17 }
 0x11a   : > { %v2080_v18 = vpop.f32.mrf.mxu2 }
 0x11b   : > { %833 = vrot.lane.b32.xlu2 %v629_v17, %s1768_s11  ;;  %693 = vrot.lane.b32.xlu1 %v629_v17, %s1769_s10 }
 0x11c   : > { %688 = vmatpush.msrb.mxu3 %v2080_v18 }
 0x16d   : > { %v836_v38 = vpop.permute.xlu2 %835 }
 0x175   : > { %v834_v40 = vpop.permute.xlu2 %833 }
 0x185   : > { %v696_v19 = vpop.permute.xlu1 %695 }
 0x186   : > { %1277 = vmatpush.xpose.msk.msra.mxu3 %vm632_vm1, %v696_v19 }
 0x18d   : > { %v694_v39 = vpop.permute.xlu1 %693 }
 0x19a   : > { %v656_v23 = vpop.f32.mrf.mxu3 }
 0x19b   : > { %v657_v24 = vadd.f32 %v656_v23, %v2086_v22 }
 0x19d   : > { %v659_v25 = vsel %vm632_vm1, %v657_v24, -inf }
 0x19e   : > { %660 = vmax.xlane.f32.xlu0 %v659_v25 }
 0x211   : > { %v661_v26 = vpop.xlane.xlu0 %660 }
 0x212   : > { %v662_v27 = vsub.f32 %v657_v24, %v661_v26 }
 0x214   : > { %v663_v28 = vmul.f32 1.442695, %v662_v27 }
 0x216   : > { %1418 = vpow2.f32 %v663_v28 }
 0x21c   : > { %v1419_v29 = vpop.eup %1418 }
 0x21d   : > { %v665_v30 = vsel %vm632_vm1, %v1419_v29, 0.0 }
 0x21e   : > { %666 = vadd.xlane.f32.xlu0 %v665_v30 }
 0x291   : > { %v667_v33 = vpop.xlane.xlu0 %666 }
 0x292   : > { %1420 = vrcp.f32 %v667_v33 }
 0x298   : > { %v1421_v36 = vpop.eup %1420 }
 0x299   : > { %v669_v37 = vmul.f32 %v1421_v36, %v1419_v29 }
 0x29b   : > { %1276 = vmatmul.msk.f32.vlgmr.msrb.gmra.mxu3 %vm632_vm1, %v669_v37 }
 0x29c   : > { %1290 = vmatpush.xpose.msk.msrb.mxu3 %vm632_vm1, %v836_v38 }
 0x2a3   : > { %1278 = vmatmul.msk.f32.vlgmr.msra.gmra.mxu3 %vm632_vm1, %v694_v39 }
 0x2ab   : > { %1291 = vmatmul.msk.f32.vlgmr.msrb.gmra.mxu3 %vm632_vm1, %v834_v40 }
 0x31e   : > { %v690_v41 = vpop.f32.mrf.mxu3 }
 0x31f   : > { %1289 = vmatmul.msk.f32.vlgmr.msrb.gmra.mxu2 %vm632_vm1, %v690_v41 }
 0x326   : > { %v718_v42 = vpop.f32.mrf.mxu3 }
 0x327   : > { %v719_v43 = vadd.f32 %v718_v42, %v2086_v22 }
 0x329   : > { %v721_v44 = vsel %vm632_vm1, %v719_v43, -inf }
 0x32a   : > { %722 = vmax.xlane.f32.xlu0 %v721_v44 }
 0x32e   : > { %v858_v45 = vpop.f32.mrf.mxu3 }
 0x32f   : > { %v859_v46 = vadd.f32 %v858_v45, %v2086_v22 }
 0x331   : > { %v861_v47 = vsel %vm632_vm1, %v859_v46, -inf }
 0x332   : > { %862 = vmax.xlane.f32.xlu1 %v861_v47 }
 0x33e   : > { %733 = vrot.lane.b32.xlu0 %v2080_v18, %s1769_s10 }
 0x34b   : > { %938 = vrot.lane.b32.xlu1 %v629_v17, %s1771_s5 }
 0x353   : > { %767 = vrot.lane.b32.xlu1 %v2095_v32, %s1769_s10 }
 0x35b   : > { %763 = vrot.lane.b32.xlu1 %v2103_v35, %s1769_s10 }
 0x363   : > { %977 = vrot.lane.b32.xlu1 %v2080_v18, %s1771_s5 }
 0x36b   : > { %1009 = vrot.lane.b32.xlu1 %v2091_v31, %s1771_s5 }
 0x373   : > { %902 = vrot.lane.b32.xlu1 %v2095_v32, %s1768_s11 }
 0x37b   : > { %900 = vrot.lane.b32.xlu1 %v2099_v34, %s1768_s11 }
 0x383   : > { %898 = vrot.lane.b32.xlu1 %v2103_v35, %s1768_s11 }
 0x39d   : > { %v723_v48 = vpop.xlane.xlu0 %722 }
 0x39e   : > { %v724_v49 = vsub.f32 %v719_v43, %v723_v48 }
 0x3a0   : > { %v725_v50 = vmul.f32 1.442695, %v724_v49 }
 0x3a2   : > { %1422 = vpow2.f32 %v725_v50 }
 0x3a5   : > { %v863_v51 = vpop.xlane.xlu1 %862 }
 0x3a6   : > { %v864_v52 = vsub.f32 %v859_v46, %v863_v51 }
 0x3a8   : > { %v1423_v53 = vpop.eup %1422  ;;  %v865_v54 = vmul.f32 1.442695, %v864_v52 }
 0x3a9   : > { %v727_v55 = vsel %vm632_vm1, %v1423_v53, 0.0 }
 0x3aa   : > { %1424 = vpow2.f32 %v865_v54  ;;  %728 = vadd.xlane.f32.xlu2 %v727_v55 }
 0x3b0   : > { %v1425_v56 = vpop.eup %1424  ;;  %v734_v57 = vpop.permute.xlu0 %733 }
 0x3b1   : > { %754 = vmatpush.msrb.mxu0 %v734_v57  ;;  %v867_v58 = vsel %vm632_vm1, %v1425_v56, 0.0 }
 0x3b2   : > { %868 = vadd.xlane.f32.xlu0 %v867_v58 }
 0x3bd   : > { %v939_v59 = vpop.permute.xlu1 %938 }
 0x3c2   : > { %940 = vrot.lane.b32.xlu2 %v2069_v15, %s1771_s5 }
 0x3c5   : > { %v768_v0 = vpop.permute.xlu1 %767 }
 0x3c6   : > { %872 = vrot.lane.b32.xlu0 %v2080_v18, %s1768_s11 }
 0x3ca   : > { %769 = vrot.lane.b32.xlu2 %v2091_v31, %s1769_s10 }
 0x3cd   : > { %v764_v3 = vpop.permute.xlu1 %763 }
 0x3d2   : > { %765 = vrot.lane.b32.xlu2 %v2099_v34, %s1769_s10 }
 0x3d5   : > { %v978_v8 = vpop.permute.xlu1 %977 }
 0x3dd   : > { %v1010_v14 = vpop.permute.xlu1 %1009 }
 0x3de   : > { %1301 = vmatpush.xpose.msk.msra.mxu2 %vm632_vm1, %v1010_v14 }
 0x3e5   : > { %v903_v18 = vpop.permute.xlu1 %902 }
 0x41d   : > { %v729_v60 = vpop.xlane.xlu2 %728 }
 0x41e   : > { %1426 = vrcp.f32 %v729_v60 }
 0x424   : > { %v1427_v61 = vpop.eup %1426 }
 0x425   : > { %v941_v62 = vpop.permute.xlu2 %940  ;;  %v731_v63 = vmul.f32 %v1427_v61, %v1423_v53  ;;  %v869_v1 = vpop.xlane.xlu0 %868 }
 0x426   : > { %1428 = vrcp.f32 %v869_v1 }
 0x427   : > { %1279 = vmatmul.msk.f32.vlgmr.msrb.gmra.mxu0 %vm632_vm1, %v731_v63 }
 0x42c   : > { %v1429_v4 = vpop.eup %1428 }
 0x42d   : > { %v770_v2 = vpop.permute.xlu2 %769  ;;  %v871_v6 = vmul.f32 %v1429_v4, %v1425_v56 }
 0x42e   : > { %1280 = vmatpush.xpose.msk.msrb.mxu1 %vm632_vm1, %v770_v2 }
 0x432   : > { %1281 = vmatpush.xpose.msk.msrb.mxu1 %vm632_vm1, %v768_v0 }
 0x435   : > { %v766_v5 = vpop.permute.xlu2 %765 }
 0x436   : > { %1282 = vmatpush.xpose.msk.msrb.mxu1 %vm632_vm1, %v766_v5 }
 0x438   : > { %v873_v7 = vpop.permute.xlu0 %872 }
 0x439   : > { %893 = vmatpush.msra.mxu0 %v873_v7 }
 0x43a   : > { %1283 = vmatpush.xpose.msk.msrb.mxu1 %vm632_vm1, %v764_v3  ;;  %1292 = vmatmul.msk.f32.vlgmr.msra.gmra.mxu0 %vm632_vm1, %v871_v6 }
 0x43b   : > { %1298 = vmatpush.xpose.msk.msrb.mxu0 %vm632_vm1, %v941_v62 }
 0x43e   : > { %998 = vmatpush.msra.mxu1 %v978_v8 }
 0x442   : > { %1299 = vmatmul.msk.f32.vlgmr.msrb.gmra.mxu0 %vm632_vm1, %v939_v59 }
 0x4a4   : > { %v756_v9 = vpop.f32.mrf.mxu0 }
 0x4a5   : > { %1284 = vmatmul.msk.f32.vlgmr.msrb.gmra.mxu1 %vm632_vm1, %v756_v9 }
 0x4b7   : > { %v895_v10 = vpop.f32.mrf.mxu0 }
 0x4bf   : > { %v963_v11 = vpop.f32.mrf.mxu0 }
 0x4c0   : > { %v964_v12 = vadd.f32 %v963_v11, %v2086_v22  ;;  %v901_v22 = vpop.permute.xlu1 %900 }
 0x4c2   : > { %v966_v13 = vsel %vm632_vm1, %v964_v12, -inf }
 0x4c3   : > { %967 = vmax.xlane.f32.xlu0 %v966_v13 }
 0x4c8   : > { %v899_v23 = vpop.permute.xlu1 %898 }
 0x4d7   : > { %904 = vrot.lane.b32.xlu0 %v2091_v31, %s1768_s11 }
 0x4df   : > { %1007 = vrot.lane.b32.xlu0 %v2095_v32, %s1771_s5  ;;  %v830_v32 = vpop.f32.mrf.mxu2 }
 0x4e7   : > { %1005 = vrot.lane.b32.xlu0 %v2099_v34, %s1771_s5 }
 0x4ef   : > { %1003 = vrot.lane.b32.xlu0 %v2103_v35, %s1771_s5 }
 0x522   : > { %v799_v30 = vpop.f32.mrf.mxu1 }
 0x523   : > { %v831_v34 = vadd.f32 %v830_v32, %v799_v30 }
 0x536   : > { %v968_v15 = vpop.xlane.xlu0 %967 }
 0x537   : > { %v969_v16 = vsub.f32 %v964_v12, %v968_v15 }
 0x539   : > { %v970_v17 = vmul.f32 1.442695, %v969_v16 }
 0x53b   : > { %1430 = vpow2.f32 %v970_v17 }
 0x541   : > { %v1431_v19 = vpop.eup %1430 }
 0x542   : > { %v972_v20 = vsel %vm632_vm1, %v1431_v19, 0.0 }
 0x543   : > { %973 = vadd.xlane.f32.xlu2 %v972_v20 }
 0x549   : > { %v905_v21 = vpop.permute.xlu0 %904 }
 0x54a   : > { %1293 = vmatpush.xpose.msk.msra.mxu3 %vm632_vm1, %v905_v21 }
 0x54e   : > { %1294 = vmatpush.xpose.msk.msra.mxu3 %vm632_vm1, %v903_v18 }
 0x551   : > { %v1008_v26 = vpop.permute.xlu0 %1007 }
 0x552   : > { %1295 = vmatpush.xpose.msk.msra.mxu3 %vm632_vm1, %v901_v22  ;;  %1302 = vmatpush.xpose.msk.msra.mxu2 %vm632_vm1, %v1008_v26 }
 0x556   : > { %1296 = vmatpush.xpose.msk.msra.mxu3 %vm632_vm1, %v899_v23 }
 0x559   : > { %1297 = vmatmul.msk.f32.vlgmr.msra.gmra.mxu3 %vm632_vm1, %v895_v10  ;;  %v1006_v28 = vpop.permute.xlu0 %1005 }
 0x55a   : > { %1303 = vmatpush.xpose.msk.msra.mxu2 %vm632_vm1, %v1006_v28 }
 0x561   : > { %v1004_v29 = vpop.permute.xlu0 %1003 }
 0x562   : > { %1304 = vmatpush.xpose.msk.msra.mxu2 %vm632_vm1, %v1004_v29 }
 0x5b6   : > { %v974_v24 = vpop.xlane.xlu2 %973 }
 0x5b7   : > { %1432 = vrcp.f32 %v974_v24 }
 0x5bd   : > { %v1433_v25 = vpop.eup %1432 }
 0x5be   : > { %v976_v27 = vmul.f32 %v1433_v25, %v1431_v19 }
 0x5c0   : > { %1300 = vmatmul.msk.f32.vlgmr.msra.gmra.mxu1 %vm632_vm1, %v976_v27 }
 0x5dc   : > { %v934_v33 = vpop.f32.mrf.mxu3 }
 0x5dd   : > { %v937_v35 = vadd.f32 %v934_v33, %v831_v34 }
 0x63d   : > { %v1000_v31 = vpop.f32.mrf.mxu1 }
 0x63e   : > { %1305 = vmatmul.msk.f32.vlgmr.msra.gmra.mxu2 %vm632_vm1, %v1000_v31 }
 0x6c1   : > { %v1039_v36 = vpop.f32.mrf.mxu2 }
 0x6c2   : > { %v1042_v37 = vadd.f32 %v1039_v36, %v937_v35 }
 0x6c4   : > { %1043 = vst.msk [vmem:[%s502_s23] sm:$0xff] %vm523_vm0, %v1042_v37 }
 0x6c5   : > { %1701 = shalt.err (!%p1698_p8)
}
 0x6c6   : > { %1334 = dma.vmem_to_hbm [thread:$0]  (%p1897_p3), %s1058_s19, 128, %s1060_s21, %s1045_s14  }
 0x6c7 PF: > { %s1071_s7 = sand.u32 1, %s1748_s27   ;;  %p2258_p9 = scmp.ge.s32.totalorder %s1760_s30, 2 }
 0x6c8   : > { %s1072_s13 = scalar_lea.sflag [#allocation4], %s1071_s7 }
 0x6c9   : > { %p1363_p12 = pnand %p2258_p9, %p1852_p6 }
 0x6cb   : > { %p1364_p0 = pneg %p1363_p12 }
 0x6cd   : > { %1743 = dma.done.wait (%p1364_p0), %s1072_s13, 128  }
 0x6ce   : > { %1745 = vsyncadd (%p1364_p0), %s1072_s13, 4294967168  ;;  %s2259_s30 = sld [smem:[#allocation25_spill]]  ;;  %s2261_s27 = smov %s1752_s28 }
 0x6cf   : > { %s2260_s24 = sld [smem:[#allocation26_spill]]  ;;  %s2262_s28 = smov %s1756_s29 }
 0x6d4   : > { %p29_p5 = scmp.ge.s32.totalorder %s2259_s30, 4  }
 0x6d5   : > { %s2263_s29 = smov %s2260_s24 }
 0x6d6   :  { %31 = sbr.rel (!%p29_p5) target bundleno = 17 (0x11), region = 150 }
 0x6db   :  { %1078 = vsyncpa [#allocation3], 1 }
 0x6dc   :  { %1080 = vsyncpa [#allocation3 + $0x1], 1 }
 0x6dd   :  { %1081 = vsyncpa [#allocation6], 1 }
 0x6de   :  { %1083 = vsyncpa [#allocation6 + $0x1], 1 }
 0x6df   :  { %1084 = vsyncpa [#allocation9], 1 }
 0x6e0   :  { %1086 = vsyncpa [#allocation9 + $0x1], 1 }
 0x6e1   :  { %1087 = vsyncpa [#allocation12], 1 }
 0x6e2   :  { %1088 = vsyncpa [#allocation15], 1 }
 0x6e3   :  { %1089 = vsyncpa [#allocation4], 1 }
 0x6e4   :  { %1091 = vsyncpa [#allocation4 + $0x1], 1 }

</bundles_post_ra>
